<compile_context>
chip_gen: v7x
topology: tpu7x:2x2x1
jax: 0.10.0
libtpu: 0.0.40
codegen_flags: <defaults>
</compile_context>

<pallas_src>
import jax
import jax.numpy as jnp
from jax.experimental import pallas as pl
from jax.experimental.pallas import tpu as pltpu

INPUT_SIZE = 5
OUTPUT_SIZE = 2


def linear_kernel(x_ref, wb_ref, o_ref):
    # x_ref : (B, in)        f32, VMEM-resident
    # wb_ref: (in + 1, out)  f32, rows [0:in) = W.T, row [in] = bias
    # o_ref : (B, out)
    x = x_ref[...]
    w = wb_ref[:INPUT_SIZE, :]      # static sub-view of the packed operand
    b = wb_ref[INPUT_SIZE:, :]      # (1, out) bias row
    # Single MXU matmul (one vmatmul push/pop) with the bias add fused onto the
    # result vreg -- no separate bias DMA, no XLU broadcast chain.
    o_ref[...] = (jnp.dot(x, w, preferred_element_type=jnp.float32)
                  + b).astype(o_ref.dtype)


def linear_forward(x, wb):
    """y = x @ W.T + b  (PyTorch nn.Linear semantics).

    x : (B, in_features)          float32
    wb: (in_features + 1, out)    float32  -- packed [W.T ; b], built once at init
    """
    B = x.shape[0]
    out_f = wb.shape[1]
    return pl.pallas_call(
        linear_kernel,
        out_shape=jax.ShapeDtypeStruct((B, out_f), x.dtype),
        in_specs=[
            pl.BlockSpec(memory_space=pltpu.MemorySpace.VMEM),
            pl.BlockSpec(memory_space=pltpu.MemorySpace.VMEM),
        ],
        out_specs=pl.BlockSpec(memory_space=pltpu.MemorySpace.VMEM),
    )(x, wb)


def init_params(key, in_features, out_features):
    """nn.Linear-style init; returns PyTorch-layout params plus the packed
    kernel operand (weight transpose + bias row), prepared exactly once."""
    k_w, k_b = jax.random.split(key)
    bound = 1.0 / (in_features ** 0.5)
    weight = jax.random.uniform(
        k_w, (out_features, in_features), dtype=jnp.float32,
        minval=-bound, maxval=bound)                     # PyTorch layout (out, in)
    bias = jax.random.uniform(
        k_b, (out_features,), dtype=jnp.float32,
        minval=-bound, maxval=bound)
    # Packed operand: (in + 1, out) = [ W.T ; b ].  One DMA instead of two.
    wb = jnp.concatenate([weight.T, bias.reshape(1, out_features)], axis=0)
    return weight, bias, wb


if __name__ == "__main__":
    key = jax.random.PRNGKey(0)
    k_x, k_p = jax.random.split(key)

    batch = 8
    x = jax.random.normal(k_x, (batch, INPUT_SIZE), dtype=jnp.float32)

    weight, bias, wb = init_params(k_p, INPUT_SIZE, OUTPUT_SIZE)

    forward = jax.jit(linear_forward)
    out = forward(x, wb)
    out = jax.block_until_ready(out)

    # Reference check against PyTorch nn.Linear semantics: x @ W.T + b
    ref = x @ weight.T + bias
    assert out.shape == (batch, OUTPUT_SIZE)
    assert jnp.allclose(out, ref, atol=1e-5, rtol=1e-5)

    print("\tIn Model: input size", x.shape, "output size", out.shape)
    print("KERNEL_OK")
</pallas_src>

<mosaic_0001>
module attributes {stable_mosaic.version = 11 : i64} {
  func.func @linear_kernel(%arg0: memref<8x5xf32, #tpu.memory_space<vmem>>, %arg1: memref<6x2xf32, #tpu.memory_space<vmem>>, %arg2: memref<8x2xf32, #tpu.memory_space<vmem>>) attributes {dimension_semantics = [], scalar_prefetch = 0 : i64, scratch_operands = 0 : i64, tpu.core_type = #tpu.core_type<tc>} {
    %c0 = arith.constant 0 : index
    %c0_0 = arith.constant 0 : index
    %0 = vector.load %arg0[%c0, %c0_0] : memref<8x5xf32, #tpu.memory_space<vmem>>, vector<8x5xf32>
    %c0_1 = arith.constant 0 : index
    %c0_2 = arith.constant 0 : index
    %1 = vector.load %arg1[%c0_1, %c0_2] : memref<6x2xf32, #tpu.memory_space<vmem>>, vector<5x2xf32>
    %c5 = arith.constant 5 : index
    %c0_3 = arith.constant 0 : index
    %2 = vector.load %arg1[%c5, %c0_3] : memref<6x2xf32, #tpu.memory_space<vmem>>, vector<1x2xf32>
    %cst = arith.constant dense<0.000000e+00> : vector<8x2xf32>
    %3 = tpu.matmul %0, %1, %cst {dimension_numbers = #tpu.dot_dimension_numbers<[1], [0], [0], [1], [0, 0, 1, 1], [], []>} : vector<8x5xf32>, vector<5x2xf32>, vector<8x2xf32> -> vector<8x2xf32>
    %4 = vector.broadcast %2 : vector<1x2xf32> to vector<8x2xf32>
    %5 = arith.addf %3, %4 : vector<8x2xf32>
    %c0_4 = arith.constant 0 : index
    %c0_5 = arith.constant 0 : index
    %6 = vector.load %arg2[%c0_4, %c0_5] : memref<8x2xf32, #tpu.memory_space<vmem>>, vector<8x2xf32>
    tpu.vector_store %arg2[%c0_4, %c0_5], %5 {strides = array<i32>} : memref<8x2xf32, #tpu.memory_space<vmem>>, vector<8x2xf32>,
    return
  }
}

</mosaic_0001>

<bundles_post_ra>
// kernel: linear_forward.1
= control target key start
LH: loop header
LB: loop body
LE: loop exit
PB: predicated region body
PF: predicated region fallthrough
CT: control target
= control target key end

     0   :  { %vm22_vm0 = vcmask 1044480   ;;  %vm18_vm1 = vcmask 39936   ;;  %v114_v0 = vmov 0.0   ;;  %vm115_vm2 = vmmov 0   ;;  %s143_s1 = inlined_call_operand.vmem [shape: f32[6,2], index: 1, kind: input, shape index: {}]   ;;  %s144_s0 = inlined_call_operand.vmem [shape: f32[8,5], index: 0, kind: input, shape index: {}]   ;;  %s145_s2 = inlined_call_operand.vmem [shape: f32[8,2], index: 2, kind: output, shape index: {}]  }
   0x1   :  { %107 = vmatprep.subr.mxu0 %v114_v0  ;;  %v12_v1 = vld [vmem:[%s143_s1] sm:$0x1f]  ;;  %109 = vmatprep.mubr.msk.f32.mxu0 %vm115_vm2, %v114_v0  ;;  %v102_v3 = vld [vmem:[%s143_s1 + $0x5] ss:$0 sm:$0xff]  ;;  %vm96_vm3 = vcmask 15360  }
   0x2   :  { %v11_v2 = vld [vmem:[%s144_s0] sm:$0xff]  ;;  %108 = vmatpush3.msk.msra.mxu0 %vm22_vm0, %v12_v1 }
   0x3   :  { %110 = vmatmul.mubr.msk.f32.vlgmr.msra.gmra.mrb[0].mxu0 %vm18_vm1, %v11_v2 }
  0xd6   :  { %v92_v4 = vpop.f32.mrb[0].mxu0 }
  0xd7   :  { %v93_v5 = vadd.f32 %v102_v3, %v92_v4  ;;  %v111_v6 = vpop.f32.mrb[1].mxu0 }
  0xd9   :  { %97 = vst.msk [vmem:[%s145_s2] sm:$0xff] %vm96_vm3, %v93_v5 }

</bundles_post_ra>
